<compile_context>
chip_gen: v5e
topology: v5e:2x2
jax: 0.10.0
libtpu: 0.0.40
codegen_flags: <defaults>
</compile_context>

<pallas_src>
import functools

import jax
import jax.numpy as jnp
from jax.experimental import pallas as pl
from jax.experimental.pallas import tpu as pltpu

LANE = 128  # lane width — last dim of every operand is padded to a multiple of this


def _round_up(n, m):
    return (n + m - 1) // m * m


def tenny_kernel(x_ref, w1_ref, b1_ref, w2_ref, b2_ref, w3_ref, b3_ref, o_ref):
    # fc1 + ReLU  (f32 accumulation on the MXU, f32 epilogue on the VPU)
    h = jnp.dot(x_ref[...], w1_ref[...], preferred_element_type=jnp.float32)
    h = jnp.maximum(h + b1_ref[...], 0.0).astype(w2_ref.dtype)
    # fc2 + ReLU
    h = jnp.dot(h, w2_ref[...], preferred_element_type=jnp.float32)
    h = jnp.maximum(h + b2_ref[...], 0.0).astype(w3_ref.dtype)
    # fc3 (no activation) — lane-dense (>=128-wide) store
    out = jnp.dot(h, w3_ref[...], preferred_element_type=jnp.float32)
    o_ref[...] = (out + b3_ref[...]).astype(o_ref.dtype)


def tenny_forward(x, params, *, max_batch_tile=512, compute_dtype=jnp.float32):
    """Tenny MLP forward pass with a fused Pallas TPU kernel.

    x: [B, input_size] float32
    params: dict with w1 [in,h], b1 [1,h], w2 [h,h], b2 [1,h], w3 [h,out], b3 [1,out]
    compute_dtype: jnp.float32 (exact) or jnp.bfloat16 (faster MXU path on v6e/v7x).
    """
    w1, b1, w2, b2, w3, b3 = (params[k] for k in ("w1", "b1", "w2", "b2", "w3", "b3"))
    B, in_dim = x.shape
    hid = w1.shape[1]
    out_dim = w3.shape[1]

    # Lane-dense padded feature dims (multiples of 128).
    in_p = _round_up(in_dim, LANE)
    hid_p = _round_up(hid, LANE)
    out_p = _round_up(out_dim, LANE)

    # Batch tiling: whole batch in one grid step when it fits; otherwise big tiles.
    itemsize = jnp.dtype(compute_dtype).itemsize
    sublane = 8 if itemsize == 4 else 16
    batch_tile = min(_round_up(B, sublane), _round_up(max_batch_tile, sublane))
    B_p = _round_up(B, batch_tile)
    grid = (B_p // batch_tile,)

    # Zero-pad once in the wrapper (layout plumbing). Padded weight columns AND padded bias
    # entries are zero, so the first out_dim columns of the padded result are exact.
    xp = jnp.pad(x, ((0, B_p - B), (0, in_p - in_dim))).astype(compute_dtype)
    w1p = jnp.pad(w1, ((0, in_p - in_dim), (0, hid_p - hid))).astype(compute_dtype)
    b1p = jnp.pad(b1, ((0, 0), (0, hid_p - hid)))
    w2p = jnp.pad(w2, ((0, hid_p - hid), (0, hid_p - hid))).astype(compute_dtype)
    b2p = jnp.pad(b2, ((0, 0), (0, hid_p - hid)))
    w3p = jnp.pad(w3, ((0, hid_p - hid), (0, out_p - out_dim))).astype(compute_dtype)
    b3p = jnp.pad(b3, ((0, 0), (0, out_p - out_dim)))

    # Advisory cost estimate for the XLA scheduler.
    flops = 2 * B_p * (in_p * hid_p + hid_p * hid_p + hid_p * out_p)
    bytes_accessed = (
        xp.size * xp.dtype.itemsize
        + w1p.size * w1p.dtype.itemsize + b1p.size * b1p.dtype.itemsize
        + w2p.size * w2p.dtype.itemsize + b2p.size * b2p.dtype.itemsize
        + w3p.size * w3p.dtype.itemsize + b3p.size * b3p.dtype.itemsize
        + B_p * out_p * x.dtype.itemsize
    )

    # Explicit VMEM budget: per-step blocks (x tile + resident weights/biases + out tile),
    # x2 for double buffering, + headroom; capped at 64 MiB so it also fits a v7x TC.
    block_bytes = (
        batch_tile * in_p * itemsize
        + in_p * hid_p * itemsize + hid_p * 4
        + hid_p * hid_p * itemsize + hid_p * 4
        + hid_p * out_p * itemsize + out_p * 4
        + batch_tile * out_p * x.dtype.itemsize
    )
    vmem_limit = int(min(64 << 20, max(32 << 20, 2 * block_bytes + (4 << 20))))

    def fixed(shape):
        # Whole-array block with a constant block index (fetched once, resident in VMEM).
        return pl.BlockSpec(shape, lambda i: (0, 0))

    out_padded = pl.pallas_call(
        tenny_kernel,
        out_shape=jax.ShapeDtypeStruct((B_p, out_p), x.dtype),
        grid_spec=pltpu.PrefetchScalarGridSpec(
            num_scalar_prefetch=0,
            grid=grid,
            in_specs=[
                pl.BlockSpec((batch_tile, in_p), lambda i: (i, 0)),  # x tile
                fixed((in_p, hid_p)),    # w1
                fixed((1, hid_p)),       # b1
                fixed((hid_p, hid_p)),   # w2
                fixed((1, hid_p)),       # b2
                fixed((hid_p, out_p)),   # w3
                fixed((1, out_p)),       # b3
            ],
            out_specs=pl.BlockSpec((batch_tile, out_p), lambda i: (i, 0)),
        ),
        compiler_params=pltpu.CompilerParams(
            dimension_semantics=("parallel",),  # batch axis -> 2-TC sharding on v7x
            vmem_limit_bytes=vmem_limit,
        ),
        cost_estimate=pl.CostEstimate(
            flops=int(flops), transcendentals=0, bytes_accessed=int(bytes_accessed)
        ),
    )(xp, w1p, b1p, w2p, b2p, w3p, b3p)

    # Slice back to the logical shape (drop batch and output-column padding).
    return out_padded[:B, :out_dim]


def init_params(key, input_size, hidden_size, output_size):
    """Deterministic init mirroring PyTorch nn.Linear default (uniform +-1/sqrt(fan_in)).
    Weights stored transposed: [in_features, out_features]."""
    ks = jax.random.split(key, 6)

    def lin(kw, kb, fan_in, fan_out):
        bound = 1.0 / jnp.sqrt(jnp.float32(fan_in))
        w = jax.random.uniform(kw, (fan_in, fan_out), jnp.float32, -bound, bound)
        b = jax.random.uniform(kb, (1, fan_out), jnp.float32, -bound, bound)
        return w, b

    w1, b1 = lin(ks[0], ks[1], input_size, hidden_size)
    w2, b2 = lin(ks[2], ks[3], hidden_size, hidden_size)
    w3, b3 = lin(ks[4], ks[5], hidden_size, output_size)
    return dict(w1=w1, b1=b1, w2=w2, b2=b2, w3=w3, b3=b3)


def tenny_ref(x, p):
    h = jnp.maximum(x @ p["w1"] + p["b1"], 0.0)
    h = jnp.maximum(h @ p["w2"] + p["b2"], 0.0)
    return h @ p["w3"] + p["b3"]


if __name__ == "__main__":
    key = jax.random.PRNGKey(0)
    k_x, k_p = jax.random.split(key)

    # Toy shapes consistent with the module (note: at this ~2 KFLOP size, launch/DMA latency
    # dominates; the kernel is structured so larger batch/hidden sizes scale properly).
    batch, input_size, hidden_size, output_size = 16, 16, 32, 1
    x = jax.random.normal(k_x, (batch, input_size), jnp.float32)
    params = init_params(k_p, input_size, hidden_size, output_size)

    fwd = jax.jit(functools.partial(tenny_forward, compute_dtype=jnp.float32))
    out = jax.block_until_ready(fwd(x, params))

    ref = tenny_ref(x, params)
    assert out.shape == (batch, output_size)
    assert jnp.allclose(out, ref, atol=1e-5, rtol=1e-5), "mismatch vs reference"

    print("KERNEL_OK")
</pallas_src>

<mosaic_0001>
module attributes {stable_mosaic.version = 11 : i64} {
  func.func @tenny_kernel(%arg0: i32, %arg1: memref<16x128xf32, #tpu.memory_space<vmem>>, %arg2: memref<128x128xf32, #tpu.memory_space<vmem>>, %arg3: memref<1x128xf32, #tpu.memory_space<vmem>>, %arg4: memref<128x128xf32, #tpu.memory_space<vmem>>, %arg5: memref<1x128xf32, #tpu.memory_space<vmem>>, %arg6: memref<128x128xf32, #tpu.memory_space<vmem>>, %arg7: memref<1x128xf32, #tpu.memory_space<vmem>>, %arg8: memref<16x128xf32, #tpu.memory_space<vmem>>) attributes {dimension_semantics = [#tpu.dimension_semantics<parallel>], iteration_bounds = array<i64: 1>, scalar_prefetch = 0 : i64, scratch_operands = 0 : i64, tpu.core_type = #tpu.core_type<tc>, window_params = [{transform_indices = @transform_0, window_bounds = array<i64: 16, 128>}, {pipeline_mode = #tpu.pipeline_mode<synchronous>, transform_indices = @transform_1, window_bounds = array<i64: 128, 128>}, {pipeline_mode = #tpu.pipeline_mode<synchronous>, transform_indices = @transform_2, window_bounds = array<i64: 1, 128>}, {pipeline_mode = #tpu.pipeline_mode<synchronous>, transform_indices = @transform_3, window_bounds = array<i64: 128, 128>}, {pipeline_mode = #tpu.pipeline_mode<synchronous>, transform_indices = @transform_4, window_bounds = array<i64: 1, 128>}, {pipeline_mode = #tpu.pipeline_mode<synchronous>, transform_indices = @transform_5, window_bounds = array<i64: 128, 128>}, {pipeline_mode = #tpu.pipeline_mode<synchronous>, transform_indices = @transform_6, window_bounds = array<i64: 1, 128>}, {transform_indices = @transform_7, window_bounds = array<i64: 16, 128>}]} {
    %c0 = arith.constant 0 : index
    %c0_0 = arith.constant 0 : index
    %0 = vector.load %arg1[%c0, %c0_0] : memref<16x128xf32, #tpu.memory_space<vmem>>, vector<16x128xf32>
    %c0_1 = arith.constant 0 : index
    %c0_2 = arith.constant 0 : index
    %1 = vector.load %arg2[%c0_1, %c0_2] : memref<128x128xf32, #tpu.memory_space<vmem>>, vector<128x128xf32>
    %cst = arith.constant dense<0.000000e+00> : vector<16x128xf32>
    %2 = tpu.matmul %0, %1, %cst {dimension_numbers = #tpu.dot_dimension_numbers<[1], [0], [0], [1], [0, 0, 1, 1], [], []>} : vector<16x128xf32>, vector<128x128xf32>, vector<16x128xf32> -> vector<16x128xf32>
    %c0_3 = arith.constant 0 : index
    %c0_4 = arith.constant 0 : index
    %3 = vector.load %arg3[%c0_3, %c0_4] : memref<1x128xf32, #tpu.memory_space<vmem>>, vector<1x128xf32>
    %4 = vector.broadcast %3 : vector<1x128xf32> to vector<16x128xf32>
    %5 = arith.addf %2, %4 : vector<16x128xf32>
    %cst_5 = arith.constant 0.000000e+00 : f32
    %6 = vector.broadcast %cst_5 : f32 to vector<16x128xf32>
    %7 = arith.maximumf %5, %6 : vector<16x128xf32>
    %c0_6 = arith.constant 0 : index
    %c0_7 = arith.constant 0 : index
    %8 = vector.load %arg4[%c0_6, %c0_7] : memref<128x128xf32, #tpu.memory_space<vmem>>, vector<128x128xf32>
    %cst_8 = arith.constant dense<0.000000e+00> : vector<16x128xf32>
    %9 = tpu.matmul %7, %8, %cst_8 {dimension_numbers = #tpu.dot_dimension_numbers<[1], [0], [0], [1], [0, 0, 1, 1], [], []>} : vector<16x128xf32>, vector<128x128xf32>, vector<16x128xf32> -> vector<16x128xf32>
    %c0_9 = arith.constant 0 : index
    %c0_10 = arith.constant 0 : index
    %10 = vector.load %arg5[%c0_9, %c0_10] : memref<1x128xf32, #tpu.memory_space<vmem>>, vector<1x128xf32>
    %11 = vector.broadcast %10 : vector<1x128xf32> to vector<16x128xf32>
    %12 = arith.addf %9, %11 : vector<16x128xf32>
    %cst_11 = arith.constant 0.000000e+00 : f32
    %13 = vector.broadcast %cst_11 : f32 to vector<16x128xf32>
    %14 = arith.maximumf %12, %13 : vector<16x128xf32>
    %c0_12 = arith.constant 0 : index
    %c0_13 = arith.constant 0 : index
    %15 = vector.load %arg6[%c0_12, %c0_13] : memref<128x128xf32, #tpu.memory_space<vmem>>, vector<128x128xf32>
    %cst_14 = arith.constant dense<0.000000e+00> : vector<16x128xf32>
    %16 = tpu.matmul %14, %15, %cst_14 {dimension_numbers = #tpu.dot_dimension_numbers<[1], [0], [0], [1], [0, 0, 1, 1], [], []>} : vector<16x128xf32>, vector<128x128xf32>, vector<16x128xf32> -> vector<16x128xf32>
    %c0_15 = arith.constant 0 : index
    %c0_16 = arith.constant 0 : index
    %17 = vector.load %arg7[%c0_15, %c0_16] : memref<1x128xf32, #tpu.memory_space<vmem>>, vector<1x128xf32>
    %18 = vector.broadcast %17 : vector<1x128xf32> to vector<16x128xf32>
    %19 = arith.addf %16, %18 : vector<16x128xf32>
    %c0_17 = arith.constant 0 : index
    %c0_18 = arith.constant 0 : index
    %20 = vector.load %arg8[%c0_17, %c0_18] : memref<16x128xf32, #tpu.memory_space<vmem>>, vector<16x128xf32>
    tpu.vector_store %arg8[%c0_17, %c0_18], %19 {strides = array<i32>} : memref<16x128xf32, #tpu.memory_space<vmem>>, vector<16x128xf32>,
    return
  }
  func.func @transform_0(%arg0: i32) -> (i32, i32) {
    %c0_i32 = arith.constant 0 : i32
    %c0_i32_0 = arith.constant 0 : i32
    return %arg0, %c0_i32 : i32, i32
  }
  func.func @transform_1(%arg0: i32) -> (i32, i32) {
    %c0_i32 = arith.constant 0 : i32
    %c0_i32_0 = arith.constant 0 : i32
    %c0_i32_1 = arith.constant 0 : i32
    return %c0_i32, %c0_i32_0 : i32, i32
  }
  func.func @transform_2(%arg0: i32) -> (i32, i32) {
    %c0_i32 = arith.constant 0 : i32
    %c0_i32_0 = arith.constant 0 : i32
    %c0_i32_1 = arith.constant 0 : i32
    return %c0_i32, %c0_i32_0 : i32, i32
  }
  func.func @transform_3(%arg0: i32) -> (i32, i32) {
    %c0_i32 = arith.constant 0 : i32
    %c0_i32_0 = arith.constant 0 : i32
    %c0_i32_1 = arith.constant 0 : i32
    return %c0_i32, %c0_i32_0 : i32, i32
  }
  func.func @transform_4(%arg0: i32) -> (i32, i32) {
    %c0_i32 = arith.constant 0 : i32
    %c0_i32_0 = arith.constant 0 : i32
    %c0_i32_1 = arith.constant 0 : i32
    return %c0_i32, %c0_i32_0 : i32, i32
  }
  func.func @transform_5(%arg0: i32) -> (i32, i32) {
    %c0_i32 = arith.constant 0 : i32
    %c0_i32_0 = arith.constant 0 : i32
    %c0_i32_1 = arith.constant 0 : i32
    return %c0_i32, %c0_i32_0 : i32, i32
  }
  func.func @transform_6(%arg0: i32) -> (i32, i32) {
    %c0_i32 = arith.constant 0 : i32
    %c0_i32_0 = arith.constant 0 : i32
    %c0_i32_1 = arith.constant 0 : i32
    return %c0_i32, %c0_i32_0 : i32, i32
  }
  func.func @transform_7(%arg0: i32) -> (i32, i32) {
    %c0_i32 = arith.constant 0 : i32
    %c0_i32_0 = arith.constant 0 : i32
    return %arg0, %c0_i32 : i32, i32
  }
}

</mosaic_0001>

<bundles_post_ra>
// kernel: tenny_forward.1
= control target key start
LH: loop header
LB: loop body
LE: loop exit
PB: predicated region body
PF: predicated region fallthrough
CT: control target
= control target key end

     0   :  { %s391_s1 = inlined_call_operand.vmem [shape: f32[128,128], index: 1, kind: input, shape index: {}]   ;;  %s392_s3 = inlined_call_operand.vmem [shape: f32[128,128], index: 3, kind: input, shape index: {}]   ;;  %s393_s2 = inlined_call_operand.vmem [shape: f32[1,128], index: 2, kind: input, shape index: {}]   ;;  %s394_s0 = inlined_call_operand.vmem [shape: f32[16,128], index: 0, kind: input, shape index: {}]   ;;  %s395_s4 = inlined_call_operand.vmem [shape: f32[1,128], index: 4, kind: input, shape index: {}]   ;;  %s396_s5 = inlined_call_operand.vmem [shape: f32[128,128], index: 5, kind: input, shape index: {}]   ;;  %s397_s6 = inlined_call_operand.vmem [shape: f32[1,128], index: 6, kind: input, shape index: {}]   ;;  %s398_s7 = inlined_call_operand.vmem [shape: f32[16,128], index: 7, kind: output, shape index: {}]  }
   0x1   :  { %v43_v0 = vld [vmem:[%s391_s1 + $0x78] sm:$0xff]  ;;  %v42_v1 = vld [vmem:[%s391_s1 + $0x70] sm:$0xff]  ;;  %v41_v2 = vld [vmem:[%s391_s1 + $0x68] sm:$0xff] }
   0x2   :  { %48 = vmatpush.msra.mxu0 %v43_v0  ;;  %167 = vmatpush.msra.mxu3 %v43_v0  ;;  %v40_v3 = vld [vmem:[%s391_s1 + $0x60] sm:$0xff]  ;;  %v39_v4 = vld [vmem:[%s391_s1 + $0x58] sm:$0xff]  ;;  %v87_v6 = vld [vmem:[%s392_s3 + $0x70] sm:$0xff] }
   0x3   :  { %v88_v5 = vld [vmem:[%s392_s3 + $0x78] sm:$0xff]  ;;  %v38_v7 = vld [vmem:[%s391_s1 + $0x50] sm:$0xff]  ;;  %v86_v8 = vld [vmem:[%s392_s3 + $0x68] sm:$0xff] }
   0x4   :  { %49 = vmatpush.msra.mxu0 %v42_v1  ;;  %168 = vmatpush.msra.mxu3 %v42_v1  ;;  %v37_v9 = vld [vmem:[%s391_s1 + $0x48] sm:$0xff]  ;;  %v85_v10 = vld [vmem:[%s392_s3 + $0x60] sm:$0xff]  ;;  %v84_v12 = vld [vmem:[%s392_s3 + $0x58] sm:$0xff] }
   0x5   :  { %93 = vmatpush.msra.mxu1 %v88_v5  ;;  %v36_v11 = vld [vmem:[%s391_s1 + $0x40] sm:$0xff]  ;;  %v35_v13 = vld [vmem:[%s391_s1 + $0x38] sm:$0xff]  ;;  %v83_v14 = vld [vmem:[%s392_s3 + $0x50] sm:$0xff] }
   0x6   :  { %50 = vmatpush.msra.mxu0 %v41_v2  ;;  %169 = vmatpush.msra.mxu3 %v41_v2  ;;  %v34_v15 = vld [vmem:[%s391_s1 + $0x30] sm:$0xff]  ;;  %v82_v16 = vld [vmem:[%s392_s3 + $0x48] sm:$0xff]  ;;  %v81_v18 = vld [vmem:[%s392_s3 + $0x40] sm:$0xff] }
   0x7   :  { %94 = vmatpush.msra.mxu1 %v87_v6  ;;  %v33_v17 = vld [vmem:[%s391_s1 + $0x28] sm:$0xff]  ;;  %v32_v19 = vld [vmem:[%s391_s1 + $0x20] sm:$0xff]  ;;  %v80_v20 = vld [vmem:[%s392_s3 + $0x38] sm:$0xff] }
   0x8   :  { %51 = vmatpush.msra.mxu0 %v40_v3  ;;  %170 = vmatpush.msra.mxu3 %v40_v3  ;;  %v31_v21 = vld [vmem:[%s391_s1 + $0x18] sm:$0xff]  ;;  %v79_v22 = vld [vmem:[%s392_s3 + $0x30] sm:$0xff]  ;;  %v78_v24 = vld [vmem:[%s392_s3 + $0x28] sm:$0xff] }
   0x9   :  { %95 = vmatpush.msra.mxu1 %v86_v8  ;;  %v30_v23 = vld [vmem:[%s391_s1 + $0x10] sm:$0xff]  ;;  %v29_v25 = vld [vmem:[%s391_s1 + $0x8] sm:$0xff]  ;;  %v77_v26 = vld [vmem:[%s392_s3 + $0x20] sm:$0xff] }
   0xa   :  { %52 = vmatpush.msra.mxu0 %v39_v4  ;;  %171 = vmatpush.msra.mxu3 %v39_v4  ;;  %v28_v27 = vld [vmem:[%s391_s1] sm:$0xff]  ;;  %v27_v29 = vld [vmem:[%s394_s0 + $0x8] sm:$0xff]  ;;  %v76_v30 = vld [vmem:[%s392_s3 + $0x18] sm:$0xff] }
   0xb   :  { %96 = vmatpush.msra.mxu1 %v85_v10  ;;  %v26_v28 = vld [vmem:[%s394_s0] sm:$0xff]  ;;  %v75_v31 = vld [vmem:[%s392_s3 + $0x10] sm:$0xff]  ;;  %v74_v32 = vld [vmem:[%s392_s3 + $0x8] sm:$0xff] }
   0xc   :  { %53 = vmatpush.msra.mxu0 %v38_v7  ;;  %172 = vmatpush.msra.mxu3 %v38_v7  ;;  %v73_v33 = vld [vmem:[%s392_s3] sm:$0xff]  ;;  %v133_v34 = vld [vmem:[%s396_s5 + $0x78] sm:$0xff]  ;;  %v132_v35 = vld [vmem:[%s396_s5 + $0x70] sm:$0xff] }
   0xd   :  { %97 = vmatpush.msra.mxu1 %v84_v12  ;;  %138 = vmatpush.msra.mxu2 %v133_v34  ;;  %v131_v36 = vld [vmem:[%s396_s5 + $0x68] sm:$0xff]  ;;  %v130_v37 = vld [vmem:[%s396_s5 + $0x60] sm:$0xff]  ;;  %v129_v38 = vld [vmem:[%s396_s5 + $0x58] sm:$0xff] }
   0xe   :  { %54 = vmatpush.msra.mxu0 %v37_v9  ;;  %173 = vmatpush.msra.mxu3 %v37_v9  ;;  %v128_v39 = vld [vmem:[%s396_s5 + $0x50] sm:$0xff]  ;;  %v127_v40 = vld [vmem:[%s396_s5 + $0x48] sm:$0xff]  ;;  %v126_v41 = vld [vmem:[%s396_s5 + $0x40] sm:$0xff] }
   0xf   :  { %98 = vmatpush.msra.mxu1 %v83_v14  ;;  %139 = vmatpush.msra.mxu2 %v132_v35  ;;  %v125_v42 = vld [vmem:[%s396_s5 + $0x38] sm:$0xff]  ;;  %v183_v43 = vld [vmem:[%s393_s2] ss:$0 sm:$0xff]  ;;  %v124_v44 = vld [vmem:[%s396_s5 + $0x30] sm:$0xff] }
  0x10   :  { %55 = vmatpush.msra.mxu0 %v36_v11  ;;  %174 = vmatpush.msra.mxu3 %v36_v11  ;;  %v123_v45 = vld [vmem:[%s396_s5 + $0x28] sm:$0xff]  ;;  %v122_v48 = vld [vmem:[%s396_s5 + $0x20] sm:$0xff]  ;;  %v121_v50 = vld [vmem:[%s396_s5 + $0x18] sm:$0xff] }
  0x11   :  { %99 = vmatpush.msra.mxu1 %v82_v16  ;;  %140 = vmatpush.msra.mxu2 %v131_v36  ;;  %v120_v54 = vld [vmem:[%s396_s5 + $0x10] sm:$0xff]  ;;  %v119_v55 = vld [vmem:[%s396_s5 + $0x8] sm:$0xff]  ;;  %v118_v56 = vld [vmem:[%s396_s5] sm:$0xff] }
  0x12   :  { %56 = vmatpush.msra.mxu0 %v35_v13  ;;  %175 = vmatpush.msra.mxu3 %v35_v13  ;;  %v184_v57 = vld [vmem:[%s395_s4] ss:$0 sm:$0xff] }
  0x13   :  { %100 = vmatpush.msra.mxu1 %v81_v18  ;;  %141 = vmatpush.msra.mxu2 %v130_v37  ;;  %v185_v0 = vld [vmem:[%s397_s6] ss:$0 sm:$0xff] }
  0x14   :  { %57 = vmatpush.msra.mxu0 %v34_v15  ;;  %176 = vmatpush.msra.mxu3 %v34_v15 }
  0x15   :  { %101 = vmatpush.msra.mxu1 %v80_v20  ;;  %142 = vmatpush.msra.mxu2 %v129_v38 }
  0x16   :  { %58 = vmatpush.msra.mxu0 %v33_v17  ;;  %177 = vmatpush.msra.mxu3 %v33_v17 }
  0x17   :  { %102 = vmatpush.msra.mxu1 %v79_v22  ;;  %143 = vmatpush.msra.mxu2 %v128_v39 }
  0x18   :  { %59 = vmatpush.msra.mxu0 %v32_v19  ;;  %178 = vmatpush.msra.mxu3 %v32_v19 }
  0x19   :  { %103 = vmatpush.msra.mxu1 %v78_v24  ;;  %144 = vmatpush.msra.mxu2 %v127_v40 }
  0x1a   :  { %60 = vmatpush.msra.mxu0 %v31_v21  ;;  %179 = vmatpush.msra.mxu3 %v31_v21 }
  0x1b   :  { %104 = vmatpush.msra.mxu1 %v77_v26  ;;  %145 = vmatpush.msra.mxu2 %v126_v41 }
  0x1c   :  { %61 = vmatpush.msra.mxu0 %v30_v23  ;;  %180 = vmatpush.msra.mxu3 %v30_v23 }
  0x1d   :  { %105 = vmatpush.msra.mxu1 %v76_v30  ;;  %146 = vmatpush.msra.mxu2 %v125_v42 }
  0x1e   :  { %62 = vmatpush.msra.mxu0 %v29_v25  ;;  %181 = vmatpush.msra.mxu3 %v29_v25 }
  0x1f   :  { %106 = vmatpush.msra.mxu1 %v75_v31  ;;  %147 = vmatpush.msra.mxu2 %v124_v44 }
  0x20   :  { %63 = vmatpush.msra.mxu0 %v28_v27  ;;  %182 = vmatpush.msra.mxu3 %v28_v27 }
  0x21   :  { %64 = vmatmul.f32.vlgmr.msra.gmra.mxu0 %v26_v28  ;;  %67 = vmatmul.f32.vlgmr.msra.gmra.mxu3 %v27_v29 }
  0x22   :  { %107 = vmatpush.msra.mxu1 %v74_v32  ;;  %148 = vmatpush.msra.mxu2 %v123_v45 }
  0x24   :  { %108 = vmatpush.msra.mxu1 %v73_v33  ;;  %149 = vmatpush.msra.mxu2 %v122_v48 }
  0x26   :  { %150 = vmatpush.msra.mxu2 %v121_v50 }
  0x28   :  { %151 = vmatpush.msra.mxu2 %v120_v54 }
  0x2a   :  { %152 = vmatpush.msra.mxu2 %v119_v55 }
  0x2c   :  { %153 = vmatpush.msra.mxu2 %v118_v56 }
  0x9e   :  { %v65_v46 = vpop.f32.mrf.mxu0 }
  0x9f   :  { %v66_v47 = vadd.f32 %v183_v43, %v65_v46 }
  0xa1   :  { %v71_v49 = vmax.f32 %v66_v47, 0.0 }
  0xa3   :  { %109 = vmatmul.f32.vlgmr.msra.gmra.mxu1 %v71_v49 }
  0xa4   :  { %v68_v51 = vpop.f32.mrf.mxu3 }
  0xa5   :  { %v69_v52 = vadd.f32 %v183_v43, %v68_v51 }
  0xa7   :  { %v72_v53 = vmax.f32 %v69_v52, 0.0 }
  0xab   :  { %112 = vmatmul.f32.gmra.mxu1 %v72_v53 }
 0x120   :  { %v110_v58 = vpop.f32.mrf.mxu1 }
 0x121   :  { %v111_v59 = vadd.f32 %v184_v57, %v110_v58 }
 0x123   :  { %v116_v60 = vmax.f32 %v111_v59, 0.0 }
 0x125   :  { %154 = vmatmul.f32.vlgmr.msra.gmra.mxu2 %v116_v60 }
 0x128   :  { %v113_v61 = vpop.f32.mrf.mxu1 }
 0x129   :  { %v114_v62 = vadd.f32 %v184_v57, %v113_v61 }
 0x12b   :  { %v117_v63 = vmax.f32 %v114_v62, 0.0 }
 0x12d   :  { %157 = vmatmul.f32.gmra.mxu2 %v117_v63 }
 0x1a8   :  { %v155_v1 = vpop.f32.mrf.mxu2 }
 0x1a9   :  { %v156_v2 = vadd.f32 %v185_v0, %v155_v1 }
 0x1ab   :  { %161 = vst [vmem:[%s398_s7] sm:$0xff] %v156_v2 }
 0x1b0   :  { %v158_v3 = vpop.f32.mrf.mxu2 }
 0x1b1   :  { %v159_v4 = vadd.f32 %v185_v0, %v158_v3 }
 0x1b3   :  { %162 = vst [vmem:[%s398_s7 + $0x8] sm:$0xff] %v159_v4 }

</bundles_post_ra>
